<compile_context>
chip_gen: v6e
topology: v6e:2x2x1
jax: 0.10.0
libtpu: 0.0.40
codegen_flags: <defaults>
</compile_context>

<pallas_src>
import functools

import jax
import jax.numpy as jnp
from jax.experimental import pallas as pl
from jax.experimental.pallas import tpu as pltpu

EPS = 1e-5                       # PyTorch BatchNorm2d default eps
VMEM_LIMIT = 32 * 1024 * 1024    # explicit scoped-VMEM limit (safe on v5e/v6e/v7x)
VMEM_BUDGET = 24 * 1024 * 1024   # what the tile pickers aim to stay under


# ----------------------------------------------------------------------------
# Tile-size helpers (divisor-based: avoids ragged edge blocks; keeps >=2 blocks
# when possible so the "parallel" grid axis can shard across 2 TCs on v7x).
# ----------------------------------------------------------------------------
def _pick_m_tile(M, row_bytes, target_rows=2048):
    target = max(16, min(target_rows, M // 2 if M >= 32 else M))
    cands = [d for d in range(1, min(M, target) + 1) if M % d == 0]
    good = [d for d in cands if d % 16 == 0 and 2 * d * row_bytes <= VMEM_BUDGET]
    if good:
        return good[-1]
    ok = [d for d in cands if 2 * d * row_bytes <= VMEM_BUDGET]
    return (ok or cands)[-1]


def _pick_row_tile(H, W, cin, cout, target_rows=2048):
    cands = []
    for th in range(1, H + 1):
        if H % th:
            continue
        rows = th * W
        vmem = (2 * (th + 2) * (W + 2) * cin * 2      # halo double buffer (bf16)
                + 4 * rows * cout * 2)                # res + out blocks (double buffered)
        if rows <= target_rows and vmem <= VMEM_BUDGET:
            cands.append(th)
    for th in reversed(cands):
        if (th * W) % 16 == 0:
            return th
    return cands[-1] if cands else 1


# ----------------------------------------------------------------------------
# Kernel A: 1x1 conv == matmul over channels (+ f32 bias, optional ReLU), bf16 io
# ----------------------------------------------------------------------------
def _conv1x1_kernel(act, x_ref, w_ref, b_ref, o_ref):
    y = jnp.dot(x_ref[...], w_ref[...], preferred_element_type=jnp.float32)
    y = y + b_ref[...]
    if act:
        y = jnp.maximum(y, 0.0)
    o_ref[...] = y.astype(o_ref.dtype)


def conv1x1(x_flat, w, b, act):
    M, cin = x_flat.shape
    cout = w.shape[1]
    tm = _pick_m_tile(M, (cin + cout) * 2)
    return pl.pallas_call(
        functools.partial(_conv1x1_kernel, act),
        out_shape=jax.ShapeDtypeStruct((M, cout), jnp.bfloat16),
        grid=(M // tm,),
        in_specs=[
            pl.BlockSpec((tm, cin), lambda i: (i, 0)),
            pl.BlockSpec((cin, cout), lambda i: (0, 0)),
            pl.BlockSpec((1, cout), lambda i: (0, 0)),
        ],
        out_specs=pl.BlockSpec((tm, cout), lambda i: (i, 0)),
        compiler_params=pltpu.CompilerParams(
            dimension_semantics=("parallel",),
            vmem_limit_bytes=VMEM_LIMIT),
    )(x_flat, w, b)


# ----------------------------------------------------------------------------
# Kernel B: 3x3 conv (pad=1) + bias + ReLU + residual add (YOLOBottleneck body).
# The padded NHWC input stays in HBM; halo row-tiles (TH+2 rows, full padded
# width) are streamed into VMEM with double-buffered manual DMA. The 9 taps are
# formed from the VMEM tile and accumulated in f32 registers (single grid step,
# no reduction axis, no im2col in HBM).
# ----------------------------------------------------------------------------
def _conv3x3_res_kernel(TH, W, HT, xp_hbm, w_ref, b_ref, res_ref, o_ref, xbuf, sem):
    n = pl.program_id(0)           # batch image (parallel)
    i = pl.program_id(1)           # row tile within the image (arbitrary/sequential)
    slot = i & 1
    _, cin, cout = w_ref.shape

    def halo_copy(row_tile, s):
        return pltpu.make_async_copy(
            xp_hbm.at[n, pl.ds(row_tile * TH, TH + 2)],   # (TH+2, W+2, cin)
            xbuf.at[s],
            sem.at[s])

    @pl.when(i == 0)
    def _():                      # prime the pipeline for this image
        halo_copy(0, 0).start()

    @pl.when(i + 1 < HT)
    def _():                      # prefetch next row tile into the other slot
        halo_copy(i + 1, 1 - slot).start()

    halo_copy(i, slot).wait()

    xv = xbuf[slot]               # (TH+2, W+2, cin) bf16
    acc = jnp.zeros((TH * W, cout), jnp.float32)
    for tap in range(9):          # 9 shifted taps, accumulated in f32 registers
        ky, kx = divmod(tap, 3)
        patch = xv[ky:ky + TH, kx:kx + W, :].reshape(TH * W, cin)
        acc = acc + jnp.dot(patch, w_ref[tap], preferred_element_type=jnp.float32)
    y = jnp.maximum(acc + b_ref[...], 0.0) + res_ref[...].astype(jnp.float32)
    o_ref[...] = y.astype(o_ref.dtype)


def conv3x3_relu_residual(x_nhwc, res_flat, w9, b):
    # x_nhwc: (N, H, W, cin) bf16; res_flat: (M, cout) bf16
    # w9: (9, cin, cout) bf16 (tap (ky,kx) at index ky*3+kx); b: (1, cout) f32
    N, H, W, cin = x_nhwc.shape
    cout = w9.shape[2]
    M = N * H * W
    TH = _pick_row_tile(H, W, cin, cout)
    HT = H // TH
    rows = TH * W
    xp = jnp.pad(x_nhwc, ((0, 0), (1, 1), (1, 1), (0, 0)))   # cheap (~1.2x) halo pad
    return pl.pallas_call(
        functools.partial(_conv3x3_res_kernel, TH, W, HT),
        out_shape=jax.ShapeDtypeStruct((M, cout), jnp.bfloat16),
        grid=(N, HT),
        in_specs=[
            pl.BlockSpec(memory_space=pl.ANY),                        # padded input (HBM)
            pl.BlockSpec((9, cin, cout), lambda n, i: (0, 0, 0)),     # weights, resident
            pl.BlockSpec((1, cout), lambda n, i: (0, 0)),             # bias, resident
            pl.BlockSpec((rows, cout), lambda n, i: (n * HT + i, 0)),  # residual tile
        ],
        out_specs=pl.BlockSpec((rows, cout), lambda n, i: (n * HT + i, 0)),
        scratch_shapes=[
            pltpu.VMEM((2, TH + 2, W + 2, cin), jnp.bfloat16),        # halo double buffer
            pltpu.SemaphoreType.DMA((2,)),
        ],
        compiler_params=pltpu.CompilerParams(
            dimension_semantics=("parallel", "arbitrary"),
            vmem_limit_bytes=VMEM_LIMIT),
    )(xp, w9, b, res_flat)


# ----------------------------------------------------------------------------
# Kernel C: fully fused tail:
#   y1 = cv3(t), y2 = cv2(x), z = relu(bn(cat(y1, y2))), out = relu(cv4(z))
# The concat is avoided by splitting the BN scale/shift and cv4's weight halves.
# ----------------------------------------------------------------------------
def _csp_tail_kernel(t_ref, x_ref, w3_ref, w2_ref, s1_ref, sh1_ref, s2_ref, sh2_ref,
                     wa_ref, wb_ref, b_ref, o_ref):
    y1 = jnp.dot(t_ref[...], w3_ref[...], preferred_element_type=jnp.float32)
    y2 = jnp.dot(x_ref[...], w2_ref[...], preferred_element_type=jnp.float32)
    z1 = jnp.maximum(y1 * s1_ref[...] + sh1_ref[...], 0.0).astype(wa_ref.dtype)
    z2 = jnp.maximum(y2 * s2_ref[...] + sh2_ref[...], 0.0).astype(wb_ref.dtype)
    y = (jnp.dot(z1, wa_ref[...], preferred_element_type=jnp.float32)
         + jnp.dot(z2, wb_ref[...], preferred_element_type=jnp.float32)
         + b_ref[...])
    o_ref[...] = jnp.maximum(y, 0.0).astype(o_ref.dtype)


def csp_tail(t_flat, x_flat, w3, w2, s1, sh1, s2, sh2, wa, wb, b):
    M, c_ = t_flat.shape
    c1 = x_flat.shape[1]
    c2 = wa.shape[1]
    tm = _pick_m_tile(M, (c_ + c1 + c2) * 2)
    return pl.pallas_call(
        _csp_tail_kernel,
        out_shape=jax.ShapeDtypeStruct((M, c2), jnp.bfloat16),
        grid=(M // tm,),
        in_specs=[
            pl.BlockSpec((tm, c_), lambda i: (i, 0)),
            pl.BlockSpec((tm, c1), lambda i: (i, 0)),
            pl.BlockSpec((c_, c_), lambda i: (0, 0)),
            pl.BlockSpec((c1, c_), lambda i: (0, 0)),
            pl.BlockSpec((1, c_), lambda i: (0, 0)),
            pl.BlockSpec((1, c_), lambda i: (0, 0)),
            pl.BlockSpec((1, c_), lambda i: (0, 0)),
            pl.BlockSpec((1, c_), lambda i: (0, 0)),
            pl.BlockSpec((c_, c2), lambda i: (0, 0)),
            pl.BlockSpec((c_, c2), lambda i: (0, 0)),
            pl.BlockSpec((1, c2), lambda i: (0, 0)),
        ],
        out_specs=pl.BlockSpec((tm, c2), lambda i: (i, 0)),
        compiler_params=pltpu.CompilerParams(
            dimension_semantics=("parallel",),
            vmem_limit_bytes=VMEM_LIMIT),
    )(t_flat, x_flat, w3, w2, s1, sh1, s2, sh2, wa, wb, b)


# ----------------------------------------------------------------------------
# Parameters (deterministic synthetic init mirroring the module's __init__)
# ----------------------------------------------------------------------------
def init_params(key, c1, c2, n=1, e=0.5):
    c_ = int(c2 * e)
    ks = iter(jax.random.split(key, 64))

    def conv_w(cout, cin, k):
        return jax.random.normal(next(ks), (cout, cin, k, k), jnp.float32) * 0.3

    def bn_p(c):
        return dict(
            gamma=jax.random.uniform(next(ks), (c,), jnp.float32, 0.5, 1.5),
            beta=jax.random.normal(next(ks), (c,), jnp.float32) * 0.1,
            mean=jax.random.normal(next(ks), (c,), jnp.float32) * 0.1,
            var=jax.random.uniform(next(ks), (c,), jnp.float32, 0.5, 1.5),
        )

    return dict(
        c1=c1, c2=c2, c_=c_,
        cv1_w=conv_w(c_, c1, 1), cv1_bn=bn_p(c_),
        cv2_w=conv_w(c_, c1, 1),                    # plain conv, no bias/bn/act
        cv3_w=conv_w(c_, c_, 1),                    # plain conv, no bias/bn/act
        cv4_w=conv_w(c2, 2 * c_, 1), cv4_bn=bn_p(c2),
        bn=bn_p(2 * c_),
        m=[dict(cv1_w=conv_w(c_, c_, 1), cv1_bn=bn_p(c_),
                cv2_w=conv_w(c_, c_, 3), cv2_bn=bn_p(c_)) for _ in range(n)],
    )


def fold_bn(w, bnp):
    # folded in f32; cast to bf16 only when forming the matmul operands
    scale = bnp['gamma'] / jnp.sqrt(bnp['var'] + EPS)
    return w * scale[:, None, None, None], bnp['beta'] - bnp['mean'] * scale


# ----------------------------------------------------------------------------
# Full YOLOBottleneckCSP forward (Pallas path)
# ----------------------------------------------------------------------------
def yolo_bottleneck_csp_pallas(x_nchw, p):
    N, c1, H, W = x_nchw.shape
    c_, c2 = p['c_'], p['c2']
    M = N * H * W
    # NOTE: in a full network this block would stay NHWC end-to-end; the
    # transposes here only adapt the NCHW test interface at the boundary.
    x_flat = jnp.transpose(x_nchw, (0, 2, 3, 1)).reshape(M, c1).astype(jnp.bfloat16)

    # cv1: 1x1 ConvBnAct (relu)
    w, b = fold_bn(p['cv1_w'], p['cv1_bn'])
    t = conv1x1(x_flat, w[:, :, 0, 0].T.astype(jnp.bfloat16), b[None, :], act=True)

    # self.m: n x YOLOBottleneck(c_, c_, e=1.0): 1x1 CBA -> 3x3 CBA -> +residual
    for blk in p['m']:
        w1, b1 = fold_bn(blk['cv1_w'], blk['cv1_bn'])
        u = conv1x1(t, w1[:, :, 0, 0].T.astype(jnp.bfloat16), b1[None, :], act=True)
        w3, b3 = fold_bn(blk['cv2_w'], blk['cv2_bn'])
        w9 = jnp.stack([w3[:, :, ky, kx].T for ky in range(3) for kx in range(3)],
                       axis=0).astype(jnp.bfloat16)              # (9, c_, c_)
        t = conv3x3_relu_residual(u.reshape(N, H, W, c_), t, w9, b3[None, :])

    # fused tail: y1 = cv3(t), y2 = cv2(x), relu(bn(cat(y1,y2))) -> cv4 (1x1 CBA)
    scale = p['bn']['gamma'] / jnp.sqrt(p['bn']['var'] + EPS)
    shift = p['bn']['beta'] - p['bn']['mean'] * scale
    w4, b4 = fold_bn(p['cv4_w'], p['cv4_bn'])
    w4_2d = w4[:, :, 0, 0].T                                     # (2c_, c2), f32
    out = csp_tail(
        t, x_flat,
        p['cv3_w'][:, :, 0, 0].T.astype(jnp.bfloat16),
        p['cv2_w'][:, :, 0, 0].T.astype(jnp.bfloat16),
        scale[None, :c_], shift[None, :c_],
        scale[None, c_:], shift[None, c_:],
        w4_2d[:c_].astype(jnp.bfloat16), w4_2d[c_:].astype(jnp.bfloat16),
        b4[None, :])
    return jnp.transpose(out.reshape(N, H, W, c2), (0, 3, 1, 2)).astype(jnp.float32)


# ----------------------------------------------------------------------------
# Pure-JAX NCHW f32 reference (explicit conv / bn / relu), for validation
# ----------------------------------------------------------------------------
def _conv2d(x, w, pad=0):
    return jax.lax.conv_general_dilated(
        x, w, (1, 1), [(pad, pad), (pad, pad)],
        dimension_numbers=('NCHW', 'OIHW', 'NCHW'))


def _bn(x, bnp):
    scale = bnp['gamma'] / jnp.sqrt(bnp['var'] + EPS)
    shift = bnp['beta'] - bnp['mean'] * scale
    return x * scale[None, :, None, None] + shift[None, :, None, None]


def _cba(x, w, bnp, pad=0):
    return jax.nn.relu(_bn(_conv2d(x, w, pad), bnp))


def yolo_bottleneck_csp_ref(x, p):
    t = _cba(x, p['cv1_w'], p['cv1_bn'])
    for blk in p['m']:
        u = _cba(t, blk['cv1_w'], blk['cv1_bn'])
        u = _cba(u, blk['cv2_w'], blk['cv2_bn'], pad=1)
        t = t + u
    y1 = _conv2d(t, p['cv3_w'])
    y2 = _conv2d(x, p['cv2_w'])
    z = jax.nn.relu(_bn(jnp.concatenate([y1, y2], axis=1), p['bn']))
    return _cba(z, p['cv4_w'], p['cv4_bn'])


if __name__ == "__main__":
    key = jax.random.PRNGKey(0)
    kx, kp = jax.random.split(key)
    N, C, H, W = 2, 8, 16, 16          # c1 = c2 = 8, c_ = 4, n = 1
    x = jax.random.normal(kx, (N, C, H, W), jnp.float32)
    params = init_params(kp, c1=C, c2=C, n=1, e=0.5)

    out = jax.block_until_ready(yolo_bottleneck_csp_pallas(x, params))
    ref = jax.block_until_ready(yolo_bottleneck_csp_ref(x, params))

    assert out.shape == (N, C, H, W), out.shape
    err = float(jnp.max(jnp.abs(out - ref)))
    # bf16 activations/weights (f32 accumulation) vs. f32 reference -> bf16-level tol
    assert jnp.allclose(out, ref, rtol=3e-2, atol=3e-2), f"max abs err {err}"
    print("KERNEL_OK")
</pallas_src>

<mosaic_0001>
module attributes {stable_mosaic.version = 11 : i64} {
  func.func @_conv1x1_kernel(%arg0: i32, %arg1: memref<256x8xbf16, #tpu.memory_space<vmem>>, %arg2: memref<8x4xbf16, #tpu.memory_space<vmem>>, %arg3: memref<1x4xf32, #tpu.memory_space<vmem>>, %arg4: memref<256x4xbf16, #tpu.memory_space<vmem>>) attributes {dimension_semantics = [#tpu.dimension_semantics<parallel>], iteration_bounds = array<i64: 2>, scalar_prefetch = 0 : i64, scratch_operands = 0 : i64, tpu.core_type = #tpu.core_type<tc>, window_params = [{transform_indices = @transform_0, window_bounds = array<i64: 256, 8>}, {pipeline_mode = #tpu.pipeline_mode<synchronous>, transform_indices = @transform_1, window_bounds = array<i64: 8, 4>}, {pipeline_mode = #tpu.pipeline_mode<synchronous>, transform_indices = @transform_2, window_bounds = array<i64: 1, 4>}, {transform_indices = @transform_3, window_bounds = array<i64: 256, 4>}]} {
    %c0 = arith.constant 0 : index
    %c0_0 = arith.constant 0 : index
    %0 = vector.load %arg1[%c0, %c0_0] : memref<256x8xbf16, #tpu.memory_space<vmem>>, vector<256x8xbf16>
    %c0_1 = arith.constant 0 : index
    %c0_2 = arith.constant 0 : index
    %1 = vector.load %arg2[%c0_1, %c0_2] : memref<8x4xbf16, #tpu.memory_space<vmem>>, vector<8x4xbf16>
    %cst = arith.constant dense<0.000000e+00> : vector<256x4xf32>
    %2 = tpu.matmul %0, %1, %cst {dimension_numbers = #tpu.dot_dimension_numbers<[1], [0], [0], [1], [0, 0, 1, 1], [], []>} : vector<256x8xbf16>, vector<8x4xbf16>, vector<256x4xf32> -> vector<256x4xf32>
    %c0_3 = arith.constant 0 : index
    %c0_4 = arith.constant 0 : index
    %3 = vector.load %arg3[%c0_3, %c0_4] : memref<1x4xf32, #tpu.memory_space<vmem>>, vector<1x4xf32>
    %4 = vector.broadcast %3 : vector<1x4xf32> to vector<256x4xf32>
    %5 = arith.addf %2, %4 : vector<256x4xf32>
    %cst_5 = arith.constant 0.000000e+00 : f32
    %6 = vector.broadcast %cst_5 : f32 to vector<256x4xf32>
    %7 = arith.maximumf %5, %6 : vector<256x4xf32>
    %8 = arith.truncf %7 : vector<256x4xf32> to vector<256x4xbf16>
    %c0_6 = arith.constant 0 : index
    %c0_7 = arith.constant 0 : index
    %9 = vector.load %arg4[%c0_6, %c0_7] : memref<256x4xbf16, #tpu.memory_space<vmem>>, vector<256x4xbf16>
    tpu.vector_store %arg4[%c0_6, %c0_7], %8 {strides = array<i32>} : memref<256x4xbf16, #tpu.memory_space<vmem>>, vector<256x4xbf16>,
    return
  }
  func.func @transform_0(%arg0: i32) -> (i32, i32) {
    %c0_i32 = arith.constant 0 : i32
    %c0_i32_0 = arith.constant 0 : i32
    return %arg0, %c0_i32 : i32, i32
  }
  func.func @transform_1(%arg0: i32) -> (i32, i32) {
    %c0_i32 = arith.constant 0 : i32
    %c0_i32_0 = arith.constant 0 : i32
    %c0_i32_1 = arith.constant 0 : i32
    return %c0_i32, %c0_i32_0 : i32, i32
  }
  func.func @transform_2(%arg0: i32) -> (i32, i32) {
    %c0_i32 = arith.constant 0 : i32
    %c0_i32_0 = arith.constant 0 : i32
    %c0_i32_1 = arith.constant 0 : i32
    return %c0_i32, %c0_i32_0 : i32, i32
  }
  func.func @transform_3(%arg0: i32) -> (i32, i32) {
    %c0_i32 = arith.constant 0 : i32
    %c0_i32_0 = arith.constant 0 : i32
    return %arg0, %c0_i32 : i32, i32
  }
}

</mosaic_0001>

<bundles_post_ra>
// kernel: tpu_custom_call.1
= control target key start
LH: loop header
LB: loop body
LE: loop exit
PB: predicated region body
PF: predicated region fallthrough
CT: control target
= control target key end

     0   :  { %s973_s12 = smov 0   ;;  %s1137_s0 = inlined_call_operand.vmem [shape: bf16[512,8], index: 0, kind: input, shape index: {}]   ;;  %s1138_s1 = inlined_call_operand.vmem [shape: bf16[8,4], index: 1, kind: input, shape index: {}]   ;;  %s1139_s2 = inlined_call_operand.vmem [shape: f32[1,4], index: 2, kind: input, shape index: {}]   ;;  %s1140_s3 = inlined_call_operand.vmem [shape: bf16[512,4], index: 3, kind: output, shape index: {}]  }
   0x1 LB: > { %s758_s13 = sadd.s32 4294967295, %s951_s12   ;;  %p762_p0 = scmp.ge.s32.totalorder %s951_s12, 1  ;;  %s951_s12 = sphi %s973_s12, %s13_s12  }
   0x2   : > { %p138_p1 = scmp.lt.s32.totalorder %s951_s12, 3 }
   0x4   : > { %p139_p2 = pnand %p762_p0, %p138_p1 }
   0x5   : > { %s763_s16 = sshll.u32 (!%p139_p2), %s758_s13, 5 }
   0x6   : > { %142 = sbr.rel (%p139_p2) target bundleno = 247 (0xf7), region = 32  ;;  %p163_p3 = scmp.lt.s32.totalorder (!%p139_p2), %s763_s16, 63 }
   0xb   : > { %v207_v0 = vld [vmem:[%s1138_s1] sm:$0xf]  ;;  %vm344_vm0 = vcmask 1043456   ;;  %s1142_s16 = smov (!%p163_p3, %s763_s16), 63  ;;  %vm295_vm1 = vcmask 64512   ;;  %vm669_vm2 = vcmask 27648  }
   0xc   : > { %919 = vmatprep.subr.msk.bf16.mxu0 %vm344_vm0, %v207_v0  ;;  %920 = vmatprep.subr.msk.bf16.mxu1 %vm344_vm0, %v207_v0  ;;  %v346_v1 = vsel %vm344_vm0, %v207_v0, 0  ;;  %s764_s17 = sshll.u32 %s1142_s16, 2  ;;  %v1029_v18 = vld [vmem:[%s1139_s2] ss:$0 sm:$0xff] }
   0xd   : > { %884 = vmatpush3.bf16.msra.mxu0 %v346_v1  ;;  %918 = vmatpush3.bf16.msra.mxu1 %v346_v1  ;;  %s992_s20 = scalar_lea.vmem %s1137_s0, %s764_s17  ;;  %s1039_s25 = scalar_lea.vmem %s1140_s3, %s764_s17 }
   0xe   : > { %v929_v2 = vld [vmem:[%s992_s20] sm:$0xff]   ;;  %v931_v4 = vld [vmem:[%s992_s20 + $0x8] sm:$0xff]   ;;  %v933_v6 = vld [vmem:[%s992_s20 + $0x10] sm:$0xff]  }
   0xf   : > { %v930_v3 = vld [vmem:[%s992_s20 + $0x40] sm:$0xff]   ;;  %885 = vmatprep.mubr.msk.bf16.mxu0 %vm295_vm1, %v929_v2  ;;  %v932_v5 = vld [vmem:[%s992_s20 + $0x48] sm:$0xff]   ;;  %v934_v7 = vld [vmem:[%s992_s20 + $0x50] sm:$0xff]  }
  0x10   : > { %901 = vmatprep.mubr.msk.bf16.mxu1 %vm295_vm1, %v930_v3  ;;  %886 = vmatmul.mubr.msk.bf16.vlgmr.msra.gmra.mxu0 %vm295_vm1, %v931_v4  ;;  %v935_v8 = vld [vmem:[%s992_s20 + $0x18] sm:$0xff]   ;;  %v937_v10 = vld [vmem:[%s992_s20 + $0x20] sm:$0xff]   ;;  %v939_v12 = vld [vmem:[%s992_s20 + $0x28] sm:$0xff]  }
  0x11   : > { %902 = vmatmul.mubr.msk.bf16.vlgmr.msra.gmra.mxu1 %vm295_vm1, %v932_v5  ;;  %889 = vmatprep.mubr.msk.bf16.mxu0 %vm295_vm1, %v933_v6  ;;  %v936_v9 = vld [vmem:[%s992_s20 + $0x58] sm:$0xff]   ;;  %v938_v11 = vld [vmem:[%s992_s20 + $0x60] sm:$0xff]   ;;  %v940_v13 = vld [vmem:[%s992_s20 + $0x68] sm:$0xff]  }
  0x12   : > { %905 = vmatprep.mubr.msk.bf16.mxu1 %vm295_vm1, %v934_v7  ;;  %v941_v14 = vld [vmem:[%s992_s20 + $0x30] sm:$0xff]   ;;  %v943_v16 = vld [vmem:[%s992_s20 + $0x38] sm:$0xff]  }
  0x13   : > { %v942_v15 = vld [vmem:[%s992_s20 + $0x70] sm:$0xff]   ;;  %v944_v17 = vld [vmem:[%s992_s20 + $0x78] sm:$0xff]  }
  0x18   : > { %890 = vmatmul.mubr.msk.bf16.gmra.mxu0 %vm295_vm1, %v935_v8 }
  0x19   : > { %906 = vmatmul.mubr.msk.bf16.gmra.mxu1 %vm295_vm1, %v936_v9  ;;  %893 = vmatprep.mubr.msk.bf16.mxu0 %vm295_vm1, %v937_v10 }
  0x1a   : > { %909 = vmatprep.mubr.msk.bf16.mxu1 %vm295_vm1, %v938_v11 }
  0x20   : > { %894 = vmatmul.mubr.msk.bf16.gmra.mxu0 %vm295_vm1, %v939_v12 }
  0x21   : > { %910 = vmatmul.mubr.msk.bf16.gmra.mxu1 %vm295_vm1, %v940_v13  ;;  %897 = vmatprep.mubr.msk.bf16.mxu0 %vm295_vm1, %v941_v14 }
  0x22   : > { %913 = vmatprep.mubr.msk.bf16.mxu1 %vm295_vm1, %v942_v15 }
  0x28   : > { %898 = vmatmul.mubr.msk.bf16.gmra.mxu0 %vm295_vm1, %v943_v16 }
  0x29   : > { %914 = vmatmul.mubr.msk.bf16.gmra.mxu1 %vm295_vm1, %v944_v17 }
  0xd0   : > { %v887_v19 = vpop.f32.mrf.mxu0 }
  0xd1   : > { %v391_v20 = vadd.f32 %v887_v19, %v1029_v18  ;;  %v903_v21 = vpop.f32.mrf.mxu1 }
  0xd2   : > { %v455_v22 = vadd.f32 %v903_v21, %v1029_v18  ;;  %v382_v23 = vpop.f32.mrf.mxu0 }
  0xd3   : > { %v511_v24 = vmax.f32 %v391_v20, 0.0  ;;  %v383_v25 = vadd.f32 %v1029_v18, %v382_v23  ;;  %v446_v26 = vpop.f32.mrf.mxu1 }
  0xd4   : > { %v527_v27 = vmax.f32 %v455_v22, 0.0  ;;  %v447_v28 = vadd.f32 %v1029_v18, %v446_v26  ;;  %v888_v29 = vpop.f32.mrf.mxu0 }
  0xd5   : > { %v836_v30 = vpack.c.bf16 %v511_v24, %v511_v24  ;;  %v509_v31 = vmax.f32 %v383_v25, 0.0  ;;  %v394_v32 = vadd.f32 %v888_v29, %v1029_v18  ;;  %v904_v33 = vpop.f32.mrf.mxu1 }
  0xd6   : > { %v852_v34 = vpack.c.bf16 %v527_v27, %v527_v27  ;;  %v525_v35 = vmax.f32 %v447_v28, 0.0  ;;  %v458_v36 = vadd.f32 %v904_v33, %v1029_v18  ;;  %v385_v37 = vpop.f32.mrf.mxu0 }
  0xd7   : > { %672 = vst.msk [vmem:[%s1039_s25 + $0x8] sm:$0xf] %vm669_vm2, %v836_v30  ;;  %v834_v38 = vpack.c.bf16 %v509_v31, %v509_v31  ;;  %v512_v39 = vmax.f32 %v394_v32, 0.0  ;;  %v386_v40 = vadd.f32 %v1029_v18, %v385_v37  ;;  %v449_v41 = vpop.f32.mrf.mxu1 }
  0xd8   : > { %688 = vst.msk [vmem:[%s1039_s25 + $0x48] sm:$0xf] %vm669_vm2, %v852_v34  ;;  %v850_v42 = vpack.c.bf16 %v525_v35, %v525_v35  ;;  %v528_v43 = vmax.f32 %v458_v36, 0.0  ;;  %v450_v44 = vadd.f32 %v1029_v18, %v449_v41  ;;  %v891_v45 = vpop.f32.mrf.mxu0 }
  0xd9   : > { %670 = vst.msk [vmem:[%s1039_s25] sm:$0xf] %vm669_vm2, %v834_v38  ;;  %v837_v46 = vpack.c.bf16 %v512_v39, %v512_v39  ;;  %v510_v47 = vmax.f32 %v386_v40, 0.0  ;;  %v407_v48 = vadd.f32 %v891_v45, %v1029_v18  ;;  %v907_v49 = vpop.f32.mrf.mxu1 }
  0xda   : > { %686 = vst.msk [vmem:[%s1039_s25 + $0x40] sm:$0xf] %vm669_vm2, %v850_v42  ;;  %v853_v50 = vpack.c.bf16 %v528_v43, %v528_v43  ;;  %v526_v51 = vmax.f32 %v450_v44, 0.0  ;;  %v471_v52 = vadd.f32 %v907_v49, %v1029_v18  ;;  %v398_v53 = vpop.f32.mrf.mxu0 }
  0xdb   : > { %673 = vst.msk [vmem:[%s1039_s25 + $0xc] sm:$0xf] %vm669_vm2, %v837_v46  ;;  %v835_v54 = vpack.c.bf16 %v510_v47, %v510_v47  ;;  %v515_v55 = vmax.f32 %v407_v48, 0.0  ;;  %v399_v56 = vadd.f32 %v1029_v18, %v398_v53  ;;  %v462_v57 = vpop.f32.mrf.mxu1 }
  0xdc   : > { %689 = vst.msk [vmem:[%s1039_s25 + $0x4c] sm:$0xf] %vm669_vm2, %v853_v50  ;;  %v851_v58 = vpack.c.bf16 %v526_v51, %v526_v51  ;;  %v531_v59 = vmax.f32 %v471_v52, 0.0  ;;  %v463_v60 = vadd.f32 %v1029_v18, %v462_v57  ;;  %v892_v61 = vpop.f32.mrf.mxu0 }
  0xdd   : > { %671 = vst.msk [vmem:[%s1039_s25 + $0x4] sm:$0xf] %vm669_vm2, %v835_v54  ;;  %v840_v62 = vpack.c.bf16 %v515_v55, %v515_v55  ;;  %v513_v63 = vmax.f32 %v399_v56, 0.0  ;;  %v410_v0 = vadd.f32 %v892_v61, %v1029_v18  ;;  %v908_v1 = vpop.f32.mrf.mxu1 }
  0xde   : > { %687 = vst.msk [vmem:[%s1039_s25 + $0x44] sm:$0xf] %vm669_vm2, %v851_v58  ;;  %v856_v2 = vpack.c.bf16 %v531_v59, %v531_v59  ;;  %v529_v3 = vmax.f32 %v463_v60, 0.0  ;;  %v474_v4 = vadd.f32 %v908_v1, %v1029_v18  ;;  %v401_v5 = vpop.f32.mrf.mxu0 }
  0xdf   : > { %676 = vst.msk [vmem:[%s1039_s25 + $0x18] sm:$0xf] %vm669_vm2, %v840_v62  ;;  %v838_v6 = vpack.c.bf16 %v513_v63, %v513_v63  ;;  %v516_v7 = vmax.f32 %v410_v0, 0.0  ;;  %v402_v8 = vadd.f32 %v1029_v18, %v401_v5  ;;  %v465_v9 = vpop.f32.mrf.mxu1 }
  0xe0   : > { %692 = vst.msk [vmem:[%s1039_s25 + $0x58] sm:$0xf] %vm669_vm2, %v856_v2  ;;  %v854_v10 = vpack.c.bf16 %v529_v3, %v529_v3  ;;  %v532_v11 = vmax.f32 %v474_v4, 0.0  ;;  %v466_v12 = vadd.f32 %v1029_v18, %v465_v9  ;;  %v895_v13 = vpop.f32.mrf.mxu0 }
  0xe1   : > { %674 = vst.msk [vmem:[%s1039_s25 + $0x10] sm:$0xf] %vm669_vm2, %v838_v6  ;;  %v841_v14 = vpack.c.bf16 %v516_v7, %v516_v7  ;;  %v514_v15 = vmax.f32 %v402_v8, 0.0  ;;  %v423_v16 = vadd.f32 %v895_v13, %v1029_v18  ;;  %v911_v17 = vpop.f32.mrf.mxu1 }
  0xe2   : > { %690 = vst.msk [vmem:[%s1039_s25 + $0x50] sm:$0xf] %vm669_vm2, %v854_v10  ;;  %v857_v19 = vpack.c.bf16 %v532_v11, %v532_v11  ;;  %v530_v20 = vmax.f32 %v466_v12, 0.0  ;;  %v487_v21 = vadd.f32 %v911_v17, %v1029_v18  ;;  %v414_v22 = vpop.f32.mrf.mxu0 }
  0xe3   : > { %677 = vst.msk [vmem:[%s1039_s25 + $0x1c] sm:$0xf] %vm669_vm2, %v841_v14  ;;  %v839_v23 = vpack.c.bf16 %v514_v15, %v514_v15  ;;  %v519_v24 = vmax.f32 %v423_v16, 0.0  ;;  %v415_v25 = vadd.f32 %v1029_v18, %v414_v22  ;;  %v478_v26 = vpop.f32.mrf.mxu1 }
  0xe4   : > { %693 = vst.msk [vmem:[%s1039_s25 + $0x5c] sm:$0xf] %vm669_vm2, %v857_v19  ;;  %v855_v27 = vpack.c.bf16 %v530_v20, %v530_v20  ;;  %v535_v28 = vmax.f32 %v487_v21, 0.0  ;;  %v479_v29 = vadd.f32 %v1029_v18, %v478_v26  ;;  %v896_v30 = vpop.f32.mrf.mxu0 }
  0xe5   : > { %675 = vst.msk [vmem:[%s1039_s25 + $0x14] sm:$0xf] %vm669_vm2, %v839_v23  ;;  %v844_v31 = vpack.c.bf16 %v519_v24, %v519_v24  ;;  %v517_v32 = vmax.f32 %v415_v25, 0.0  ;;  %v426_v33 = vadd.f32 %v896_v30, %v1029_v18  ;;  %v912_v34 = vpop.f32.mrf.mxu1 }
  0xe6   : > { %691 = vst.msk [vmem:[%s1039_s25 + $0x54] sm:$0xf] %vm669_vm2, %v855_v27  ;;  %v860_v35 = vpack.c.bf16 %v535_v28, %v535_v28  ;;  %v533_v36 = vmax.f32 %v479_v29, 0.0  ;;  %v490_v37 = vadd.f32 %v912_v34, %v1029_v18  ;;  %v417_v38 = vpop.f32.mrf.mxu0 }
  0xe7   : > { %680 = vst.msk [vmem:[%s1039_s25 + $0x28] sm:$0xf] %vm669_vm2, %v844_v31  ;;  %v842_v39 = vpack.c.bf16 %v517_v32, %v517_v32  ;;  %v520_v40 = vmax.f32 %v426_v33, 0.0  ;;  %v418_v41 = vadd.f32 %v1029_v18, %v417_v38  ;;  %v481_v42 = vpop.f32.mrf.mxu1 }
  0xe8   : > { %696 = vst.msk [vmem:[%s1039_s25 + $0x68] sm:$0xf] %vm669_vm2, %v860_v35  ;;  %v858_v43 = vpack.c.bf16 %v533_v36, %v533_v36  ;;  %v536_v44 = vmax.f32 %v490_v37, 0.0  ;;  %v482_v45 = vadd.f32 %v1029_v18, %v481_v42  ;;  %v899_v46 = vpop.f32.mrf.mxu0 }
  0xe9   : > { %678 = vst.msk [vmem:[%s1039_s25 + $0x20] sm:$0xf] %vm669_vm2, %v842_v39  ;;  %v845_v47 = vpack.c.bf16 %v520_v40, %v520_v40  ;;  %v518_v48 = vmax.f32 %v418_v41, 0.0  ;;  %v439_v49 = vadd.f32 %v899_v46, %v1029_v18  ;;  %v915_v50 = vpop.f32.mrf.mxu1 }
  0xea   : > { %694 = vst.msk [vmem:[%s1039_s25 + $0x60] sm:$0xf] %vm669_vm2, %v858_v43  ;;  %v861_v51 = vpack.c.bf16 %v536_v44, %v536_v44  ;;  %v534_v52 = vmax.f32 %v482_v45, 0.0  ;;  %v503_v53 = vadd.f32 %v915_v50, %v1029_v18  ;;  %v430_v54 = vpop.f32.mrf.mxu0 }
  0xeb   : > { %681 = vst.msk [vmem:[%s1039_s25 + $0x2c] sm:$0xf] %vm669_vm2, %v845_v47  ;;  %v843_v55 = vpack.c.bf16 %v518_v48, %v518_v48  ;;  %v523_v56 = vmax.f32 %v439_v49, 0.0  ;;  %v431_v57 = vadd.f32 %v1029_v18, %v430_v54  ;;  %v494_v58 = vpop.f32.mrf.mxu1 }
  0xec   : > { %697 = vst.msk [vmem:[%s1039_s25 + $0x6c] sm:$0xf] %vm669_vm2, %v861_v51  ;;  %v859_v59 = vpack.c.bf16 %v534_v52, %v534_v52  ;;  %v539_v60 = vmax.f32 %v503_v53, 0.0  ;;  %v495_v61 = vadd.f32 %v1029_v18, %v494_v58  ;;  %v900_v62 = vpop.f32.mrf.mxu0 }
  0xed   : > { %679 = vst.msk [vmem:[%s1039_s25 + $0x24] sm:$0xf] %vm669_vm2, %v843_v55  ;;  %v848_v63 = vpack.c.bf16 %v523_v56, %v523_v56  ;;  %v521_v0 = vmax.f32 %v431_v57, 0.0  ;;  %v442_v1 = vadd.f32 %v900_v62, %v1029_v18  ;;  %v916_v2 = vpop.f32.mrf.mxu1 }
  0xee   : > { %695 = vst.msk [vmem:[%s1039_s25 + $0x64] sm:$0xf] %vm669_vm2, %v859_v59  ;;  %v864_v3 = vpack.c.bf16 %v539_v60, %v539_v60  ;;  %v537_v4 = vmax.f32 %v495_v61, 0.0  ;;  %v506_v5 = vadd.f32 %v916_v2, %v1029_v18  ;;  %v433_v6 = vpop.f32.mrf.mxu0 }
  0xef   : > { %684 = vst.msk [vmem:[%s1039_s25 + $0x38] sm:$0xf] %vm669_vm2, %v848_v63  ;;  %v846_v7 = vpack.c.bf16 %v521_v0, %v521_v0  ;;  %v524_v8 = vmax.f32 %v442_v1, 0.0  ;;  %v434_v9 = vadd.f32 %v1029_v18, %v433_v6  ;;  %v497_v10 = vpop.f32.mrf.mxu1 }
  0xf0   : > { %700 = vst.msk [vmem:[%s1039_s25 + $0x78] sm:$0xf] %vm669_vm2, %v864_v3  ;;  %v862_v11 = vpack.c.bf16 %v537_v4, %v537_v4  ;;  %v540_v12 = vmax.f32 %v506_v5, 0.0  ;;  %v498_v13 = vadd.f32 %v1029_v18, %v497_v10 }
  0xf1   : > { %682 = vst.msk [vmem:[%s1039_s25 + $0x30] sm:$0xf] %vm669_vm2, %v846_v7  ;;  %v849_v14 = vpack.c.bf16 %v524_v8, %v524_v8  ;;  %v522_v15 = vmax.f32 %v434_v9, 0.0 }
  0xf2   : > { %698 = vst.msk [vmem:[%s1039_s25 + $0x70] sm:$0xf] %vm669_vm2, %v862_v11  ;;  %v865_v16 = vpack.c.bf16 %v540_v12, %v540_v12  ;;  %v538_v17 = vmax.f32 %v498_v13, 0.0 }
  0xf3   : > { %685 = vst.msk [vmem:[%s1039_s25 + $0x3c] sm:$0xf] %vm669_vm2, %v849_v14  ;;  %v847_v19 = vpack.c.bf16 %v522_v15, %v522_v15 }
  0xf4   : > { %701 = vst.msk [vmem:[%s1039_s25 + $0x7c] sm:$0xf] %vm669_vm2, %v865_v16  ;;  %v863_v20 = vpack.c.bf16 %v538_v17, %v538_v17 }
  0xf5   : > { %683 = vst.msk [vmem:[%s1039_s25 + $0x34] sm:$0xf] %vm669_vm2, %v847_v19 }
  0xf6   : > { %699 = vst.msk [vmem:[%s1039_s25 + $0x74] sm:$0xf] %vm669_vm2, %v863_v20 }
  0xf7 PF: > { %s13_s12 = sadd.s32 1, %s951_s12  }
  0xf8   : > { %p10_p4 = scmp.ge.s32.totalorder %s13_s12, 4  }
  0xfa   :  { %12 = sbr.rel (!%p10_p4) target bundleno = 1 (0x1), region = 62 }

</bundles_post_ra>
